<compile_context>
chip_gen: v5e
topology: v5e:2x2
jax: 0.10.0
libtpu: 0.0.40
codegen_flags: <defaults>
</compile_context>

<pallas_src>
import math

import jax
import jax.numpy as jnp
from jax.experimental import pallas as pl
from jax.experimental.pallas import tpu as pltpu

d_k = d_v = 64  # matches the PyTorch module's globals


# ------------------------------ Pallas kernel ------------------------------

def _sdpa_kernel(q_ref, k_ref, v_ref, fill_ref, ctx_ref, attn_ref):
    """Whole problem in one invocation; (batch, head) folded into M/N.

    q_ref    : [M, Dk]   native dtype      (M = B*H*Sq)
    k_ref    : [N, Dk]   native dtype      (N = B*H*Sk)
    v_ref    : [N, Dv]   native dtype
    fill_ref : [M, N]    f32 fill values:   0.0   -> keep score
                                            -1e9  -> user attn_mask (masked_fill)
                                            -1e30 -> off-(batch,head) block
    ctx_ref  : [M, Dv]   native dtype
    attn_ref : [M, N]    native dtype (folded attention; the wrapper extracts
                         the per-head block diagonal)
    """
    q = q_ref[...]
    k = k_ref[...]
    v = v_ref[...]
    fill = fill_ref[...]

    # One MXU push: [M, Dk] x [N, Dk]^T -> [M, N], f32 accumulation.
    scores = jax.lax.dot_general(
        q, k, (((1,), (1,)), ((), ())),
        preferred_element_type=jnp.float32)
    scores = scores * jnp.float32(1.0 / math.sqrt(d_k))

    # torch.masked_fill semantics: REPLACE (not add) the score where masked.
    # Off-block fills (-1e30) underflow to exactly 0 after exp, so each row's
    # softmax over its own Sk keys is unaffected by the folding.
    scores = jnp.where(fill < 0.0, fill, scores)

    # Numerically stable softmax over the (128-lane dense) key axis.
    smax = jnp.max(scores, axis=-1, keepdims=True)
    p = jnp.exp(scores - smax)
    denom = jnp.sum(p, axis=-1, keepdims=True)
    attn = p / denom          # exact divide: `attention` is a returned tensor

    attn_ref[...] = attn.astype(attn_ref.dtype)

    # One MXU push: [M, N] x [N, Dv] -> [M, Dv].  Cast P back to the input
    # dtype so bf16 inputs run the MXU at its bf16 peak; accumulate in f32.
    ctx = jax.lax.dot_general(
        attn.astype(v.dtype), v, (((1,), (0,)), ((), ())),
        preferred_element_type=jnp.float32)
    ctx_ref[...] = ctx.astype(ctx_ref.dtype)


# ------------------------------- wrapper -----------------------------------

@jax.jit
def scaled_dot_product_attention(Q, K, V, attn_mask):
    """Q:[B,H,Sq,d_k]  K:[B,H,Sk,d_k]  V:[B,H,Sk,d_v]
       attn_mask: bool/int, broadcastable to [B,H,Sq,Sk] (nonzero == masked).
       Returns (context [B,H,Sq,d_v], attention [B,H,Sq,Sk]) in Q's dtype."""
    B, H, Sq, Dk = Q.shape
    Sk = K.shape[2]
    Dv = V.shape[3]
    G = B * H
    M, N = G * Sq, G * Sk
    dtype = Q.dtype

    # Fold (batch, head) into the matmul rows/cols.  Plain contiguous
    # reshapes: no transposes, no dtype casts.
    Qf = Q.reshape(M, Dk)
    Kf = K.reshape(N, Dk)
    Vf = V.reshape(N, Dv)

    # Fused fill matrix (block-diagonal structure + user mask), built once:
    #   0.0   -> keep score
    #   -1e9  -> user attn_mask (same value the torch module masked_fills)
    #   -1e30 -> cross-(batch,head) position (exp underflows to exact 0)
    mask_rows = jnp.broadcast_to(attn_mask, (B, H, Sq, Sk)).astype(jnp.bool_)
    mask_rows = mask_rows.reshape(M, Sk)
    mask_tiled = jnp.tile(mask_rows, (1, G))                        # [M, N]
    row_blk = jnp.arange(M, dtype=jnp.int32) // Sq
    col_blk = jnp.arange(N, dtype=jnp.int32) // Sk
    off_block = row_blk[:, None] != col_blk[None, :]                # [M, N]
    fill = jnp.where(off_block, jnp.float32(-1e30),
                     jnp.where(mask_tiled, jnp.float32(-1e9), jnp.float32(0.0)))

    ctx_f, attn_f = pl.pallas_call(
        _sdpa_kernel,
        out_shape=(jax.ShapeDtypeStruct((M, Dv), dtype),
                   jax.ShapeDtypeStruct((M, N), dtype)),
        # No grid: single invocation, full arrays resident in VMEM.
        in_specs=[pl.BlockSpec(memory_space=pltpu.MemorySpace.VMEM)
                  for _ in range(4)],
        out_specs=(pl.BlockSpec(memory_space=pltpu.MemorySpace.VMEM),
                   pl.BlockSpec(memory_space=pltpu.MemorySpace.VMEM)),
    )(Qf, Kf, Vf, fill)

    ctx = ctx_f.reshape(B, H, Sq, Dv)
    # Extract the per-(batch,head) diagonal blocks of the folded attention.
    idx = jnp.arange(G)
    attn = attn_f.reshape(G, Sq, G, Sk)[idx, :, idx, :].reshape(B, H, Sq, Sk)
    return ctx, attn


# ------------------------- reference (plain JAX) ----------------------------

def _reference(Q, K, V, mask):
    scores = jnp.einsum('bhqd,bhkd->bhqk', Q, K,
                        precision=jax.lax.Precision.HIGHEST) / math.sqrt(d_k)
    scores = jnp.where(mask, jnp.float32(-1e9), scores)
    attn = jax.nn.softmax(scores, axis=-1)
    ctx = jnp.einsum('bhqk,bhkd->bhqd', attn, V,
                     precision=jax.lax.Precision.HIGHEST)
    return ctx, attn


if __name__ == "__main__":
    key = jax.random.PRNGKey(0)
    kq, kk, kv = jax.random.split(key, 3)

    B, H, S = 2, 8, 8
    Q = jax.random.normal(kq, (B, H, S, d_k), jnp.float32)
    K = jax.random.normal(kk, (B, H, S, d_k), jnp.float32)
    V = jax.random.normal(kv, (B, H, S, d_v), jnp.float32)

    # Key-padding style mask (True == masked), broadcast over heads/queries.
    key_pad = jnp.array([[0, 0, 0, 0, 0, 0, 1, 1],
                         [0, 0, 0, 0, 1, 1, 1, 1]], dtype=jnp.bool_)  # [B, Sk]
    attn_mask = jnp.broadcast_to(key_pad[:, None, None, :], (B, H, S, S))

    ctx, attn = scaled_dot_product_attention(Q, K, V, attn_mask)
    ctx = jax.block_until_ready(ctx)
    attn = jax.block_until_ready(attn)

    assert ctx.shape == (B, H, S, d_v), ctx.shape
    assert attn.shape == (B, H, S, S), attn.shape
    assert bool(jnp.all(jnp.isfinite(ctx))) and bool(jnp.all(jnp.isfinite(attn)))

    # Exactness checks that do not depend on matmul precision:
    #  * softmax rows sum to 1 (divide is exact -- no approx reciprocal)
    #  * masked keys get (numerically) zero attention
    assert bool(jnp.allclose(attn.sum(axis=-1), 1.0, atol=1e-5))
    assert float(jnp.max(jnp.where(attn_mask, attn, 0.0))) <= 1e-6

    # Comparison against a plain-JAX reference.  The tolerance is headroom for
    # possible f32-matmul pass-count differences between Mosaic and XLA:TPU,
    # not for any approximation inside the kernel (typical error is ~1e-6).
    ctx_ref, attn_ref = _reference(Q, K, V, attn_mask)
    assert bool(jnp.allclose(attn, attn_ref, atol=1e-2, rtol=1e-2))
    assert bool(jnp.allclose(ctx, ctx_ref, atol=1e-2, rtol=1e-2))

    print("KERNEL_OK")
</pallas_src>

<mosaic_0001>
module attributes {stable_mosaic.version = 11 : i64} {
  func.func @_sdpa_kernel(%arg0: memref<128x64xf32, #tpu.memory_space<vmem>>, %arg1: memref<128x64xf32, #tpu.memory_space<vmem>>, %arg2: memref<128x64xf32, #tpu.memory_space<vmem>>, %arg3: memref<128x128xf32, #tpu.memory_space<vmem>>, %arg4: memref<128x64xf32, #tpu.memory_space<vmem>>, %arg5: memref<128x128xf32, #tpu.memory_space<vmem>>) attributes {dimension_semantics = [], scalar_prefetch = 0 : i64, scratch_operands = 0 : i64, tpu.core_type = #tpu.core_type<tc>} {
    %c0 = arith.constant 0 : index
    %c0_0 = arith.constant 0 : index
    %0 = vector.load %arg0[%c0, %c0_0] : memref<128x64xf32, #tpu.memory_space<vmem>>, vector<128x64xf32>
    %c0_1 = arith.constant 0 : index
    %c0_2 = arith.constant 0 : index
    %1 = vector.load %arg1[%c0_1, %c0_2] : memref<128x64xf32, #tpu.memory_space<vmem>>, vector<128x64xf32>
    %c0_3 = arith.constant 0 : index
    %c0_4 = arith.constant 0 : index
    %2 = vector.load %arg2[%c0_3, %c0_4] : memref<128x64xf32, #tpu.memory_space<vmem>>, vector<128x64xf32>
    %c0_5 = arith.constant 0 : index
    %c0_6 = arith.constant 0 : index
    %3 = vector.load %arg3[%c0_5, %c0_6] : memref<128x128xf32, #tpu.memory_space<vmem>>, vector<128x128xf32>
    %cst = arith.constant dense<0.000000e+00> : vector<128x128xf32>
    %4 = tpu.matmul %0, %1, %cst {dimension_numbers = #tpu.dot_dimension_numbers<[1], [1], [0], [0], [0, 0, 1, 0], [], []>} : vector<128x64xf32>, vector<128x64xf32>, vector<128x128xf32> -> vector<128x128xf32>
    %cst_7 = arith.constant 1.250000e-01 : f32
    %5 = vector.broadcast %cst_7 : f32 to vector<128x128xf32>
    %6 = arith.mulf %4, %5 : vector<128x128xf32>
    %cst_8 = arith.constant 0.000000e+00 : f32
    %7 = vector.broadcast %cst_8 : f32 to vector<128x128xf32>
    %8 = arith.cmpf olt, %3, %7 : vector<128x128xf32>
    %9 = arith.select %8, %3, %6 : vector<128x128xi1>, vector<128x128xf32>
    %cst_9 = arith.constant dense<0xFF800000> : vector<128xf32>
    %10 = vector.multi_reduction <maximumf>, %9, %cst_9 [1] : vector<128x128xf32> to vector<128xf32>
    %11 = vector.shape_cast %10 : vector<128xf32> to vector<128x1xf32>
    %12 = vector.broadcast %11 : vector<128x1xf32> to vector<128x128xf32>
    %13 = arith.subf %9, %12 : vector<128x128xf32>
    %14 = math.exp %13 : vector<128x128xf32>
    %cst_10 = arith.constant dense<0.000000e+00> : vector<128xf32>
    %15 = vector.multi_reduction <add>, %14, %cst_10 [1] : vector<128x128xf32> to vector<128xf32>
    %16 = vector.shape_cast %15 : vector<128xf32> to vector<128x1xf32>
    %17 = vector.broadcast %16 : vector<128x1xf32> to vector<128x128xf32>
    %18 = arith.divf %14, %17 : vector<128x128xf32>
    %c0_11 = arith.constant 0 : index
    %c0_12 = arith.constant 0 : index
    %19 = vector.load %arg5[%c0_11, %c0_12] : memref<128x128xf32, #tpu.memory_space<vmem>>, vector<128x128xf32>
    tpu.vector_store %arg5[%c0_11, %c0_12], %18 {strides = array<i32>} : memref<128x128xf32, #tpu.memory_space<vmem>>, vector<128x128xf32>,
    %cst_13 = arith.constant dense<0.000000e+00> : vector<128x64xf32>
    %20 = tpu.matmul %18, %2, %cst_13 {dimension_numbers = #tpu.dot_dimension_numbers<[1], [0], [0], [1], [0, 0, 1, 1], [], []>} : vector<128x128xf32>, vector<128x64xf32>, vector<128x64xf32> -> vector<128x64xf32>
    %c0_14 = arith.constant 0 : index
    %c0_15 = arith.constant 0 : index
    %21 = vector.load %arg4[%c0_14, %c0_15] : memref<128x64xf32, #tpu.memory_space<vmem>>, vector<128x64xf32>
    tpu.vector_store %arg4[%c0_14, %c0_15], %20 {strides = array<i32>} : memref<128x64xf32, #tpu.memory_space<vmem>>, vector<128x64xf32>,
    return
  }
}

</mosaic_0001>

<bundles_post_ra>
// kernel: scaled_dot_product_attention.1
= control target key start
LH: loop header
LB: loop body
LE: loop exit
PB: predicated region body
PF: predicated region fallthrough
CT: control target
= control target key end

     0   :  { %vm84_vm0 = vcmask 523264   ;;  %s1567_s0 = inlined_call_operand.vmem [shape: f32[128,64], index: 0, kind: input, shape index: {}]   ;;  %s1568_s1 = inlined_call_operand.vmem [shape: f32[128,64], index: 1, kind: input, shape index: {}]   ;;  %s1569_s2 = inlined_call_operand.vmem [shape: f32[128,64], index: 2, kind: input, shape index: {}]   ;;  %s1570_s3 = inlined_call_operand.vmem [shape: f32[128,128], index: 3, kind: input, shape index: {}]   ;;  %s1571_s4 = inlined_call_operand.hbm [shape: f32[128,64], index: 4, kind: output, shape index: {0}]   ;;  %s1572_s5 = inlined_call_operand.vmem [shape: f32[128,128], index: 5, kind: output, shape index: {1}]  }
   0x1   :  { %v51_v0 = vld [vmem:[%s1568_s1 + $0x78] sm:$0xff]  ;;  %v50_v1 = vld [vmem:[%s1568_s1 + $0x70] sm:$0xff] }
   0x2   :  { %765 = vmatpush.xpose.msk.msra.mxu0 %vm84_vm0, %v51_v0  ;;  %797 = vmatpush.xpose.msk.msra.mxu2 %vm84_vm0, %v51_v0 }
   0x3   :  { %798 = vmatpush.xpose.msk.msra.mxu3 %vm84_vm0, %v51_v0 }
   0x4   :  { %11 = vsyncpa [#allocation3], 0  ;;  %v49_v2 = vld [vmem:[%s1568_s1 + $0x68] sm:$0xff]  ;;  %v48_v3 = vld [vmem:[%s1568_s1 + $0x60] sm:$0xff]  ;;  %s749_s17 = sshll.u32 %s1571_s4, 4  ;;  %s955_s18 = smov 128   ;;  %s750_s17 = int_to_ptr.hbm [resolvable:$true] %s749_s17 }
   0x5   :  { %v47_v4 = vld [vmem:[%s1568_s1 + $0x58] sm:$0xff]  ;;  %v46_v5 = vld [vmem:[%s1568_s1 + $0x50] sm:$0xff]  ;;  %v45_v6 = vld [vmem:[%s1568_s1 + $0x48] sm:$0xff]  ;;  %s956_s19 = smov 8  }
   0x6   :  { %766 = vmatpush.xpose.msk.msra.mxu0 %vm84_vm0, %v50_v1  ;;  %799 = vmatpush.xpose.msk.msra.mxu2 %vm84_vm0, %v50_v1  ;;  %v44_v7 = vld [vmem:[%s1568_s1 + $0x40] sm:$0xff]  ;;  %v43_v8 = vld [vmem:[%s1568_s1 + $0x38] sm:$0xff]  ;;  %v42_v9 = vld [vmem:[%s1568_s1 + $0x30] sm:$0xff] }
   0x7   :  { %800 = vmatpush.xpose.msk.msra.mxu3 %vm84_vm0, %v50_v1  ;;  %v41_v10 = vld [vmem:[%s1568_s1 + $0x28] sm:$0xff]  ;;  %v40_v11 = vld [vmem:[%s1568_s1 + $0x20] sm:$0xff]  ;;  %v39_v12 = vld [vmem:[%s1568_s1 + $0x18] sm:$0xff] }
   0x8   :  { %v38_v13 = vld [vmem:[%s1568_s1 + $0x10] sm:$0xff]  ;;  %v37_v14 = vld [vmem:[%s1568_s1 + $0x8] sm:$0xff]  ;;  %v36_v15 = vld [vmem:[%s1568_s1] sm:$0xff] }
   0x9   :  { %v20_v16 = vld [vmem:[%s1567_s0] sm:$0xff]  ;;  %v25_v17 = vld [vmem:[%s1567_s0 + $0x28] sm:$0xff]  ;;  %v26_v20 = vld [vmem:[%s1567_s0 + $0x30] sm:$0xff] }
   0xa   :  { %767 = vmatpush.xpose.msk.msra.mxu0 %vm84_vm0, %v49_v2  ;;  %801 = vmatpush.xpose.msk.msra.mxu2 %vm84_vm0, %v49_v2  ;;  %v32_v18 = vld [vmem:[%s1567_s0 + $0x60] sm:$0xff]  ;;  %v21_v19 = vld [vmem:[%s1567_s0 + $0x8] sm:$0xff]  ;;  %v22_v22 = vld [vmem:[%s1567_s0 + $0x10] sm:$0xff] }
   0xb   :  { %802 = vmatpush.xpose.msk.msra.mxu3 %vm84_vm0, %v49_v2  ;;  %v33_v21 = vld [vmem:[%s1567_s0 + $0x68] sm:$0xff]  ;;  %v27_v23 = vld [vmem:[%s1567_s0 + $0x38] sm:$0xff]  ;;  %v34_v24 = vld [vmem:[%s1567_s0 + $0x70] sm:$0xff] }
   0xc   :  { %v23_v25 = vld [vmem:[%s1567_s0 + $0x18] sm:$0xff]  ;;  %v28_v26 = vld [vmem:[%s1567_s0 + $0x40] sm:$0xff]  ;;  %v29_v28 = vld [vmem:[%s1567_s0 + $0x48] sm:$0xff] }
   0xd   :  { %v24_v27 = vld [vmem:[%s1567_s0 + $0x20] sm:$0xff]  ;;  %v30_v29 = vld [vmem:[%s1567_s0 + $0x50] sm:$0xff]  ;;  %v31_v30 = vld [vmem:[%s1567_s0 + $0x58] sm:$0xff] }
   0xe   :  { %768 = vmatpush.xpose.msk.msra.mxu0 %vm84_vm0, %v48_v3  ;;  %803 = vmatpush.xpose.msk.msra.mxu2 %vm84_vm0, %v48_v3  ;;  %v35_v32 = vld [vmem:[%s1567_s0 + $0x78] sm:$0xff]  ;;  %v74_v35 = vld [vmem:[%s1570_s3 + $0x30] sm:$0xff]  ;;  %v76_v52 = vld [vmem:[%s1570_s3 + $0x40] sm:$0xff] }
   0xf   :  { %804 = vmatpush.xpose.msk.msra.mxu3 %vm84_vm0, %v48_v3  ;;  %v70_v36 = vld [vmem:[%s1570_s3 + $0x10] sm:$0xff]  ;;  %vm268_vm1 = vcmp.lt.f32.partialorder %v74_v35, 0.0  ;;  %v75_v43 = vld [vmem:[%s1570_s3 + $0x38] sm:$0xff]  ;;  %v72_v53 = vld [vmem:[%s1570_s3 + $0x20] sm:$0xff]  ;;  %vm270_vm5 = vcmp.lt.f32.partialorder %v76_v52, 0.0 }
  0x10   :  { %vm264_vm2 = vcmp.lt.f32.partialorder %v70_v36, 0.0  ;;  %v71_v44 = vld [vmem:[%s1570_s3 + $0x18] sm:$0xff]  ;;  %vm269_vm3 = vcmp.lt.f32.partialorder %v75_v43, 0.0  ;;  %vm266_vm6 = vcmp.lt.f32.partialorder %v72_v53, 0.0  ;;  %v77_v61 = vld [vmem:[%s1570_s3 + $0x48] sm:$0xff] }
  0x11   :  { %vm265_vm4 = vcmp.lt.f32.partialorder %v71_v44, 0.0  ;;  %v81_v62 = vld [vmem:[%s1570_s3 + $0x68] sm:$0xff]  ;;  %vm271_vm7 = vcmp.lt.f32.partialorder %v77_v61, 0.0 }
  0x12   :  { %769 = vmatpush.xpose.msk.msra.mxu0 %vm84_vm0, %v47_v4  ;;  %805 = vmatpush.xpose.msk.msra.mxu2 %vm84_vm0, %v47_v4  ;;  %v73_v63 = vld [vmem:[%s1570_s3 + $0x28] sm:$0xff]  ;;  %vm275_vm8 = vcmp.lt.f32.partialorder %v81_v62, 0.0 }
  0x13   :  { %806 = vmatpush.xpose.msk.msra.mxu3 %vm84_vm0, %v47_v4  ;;  %vm267_vm9 = vcmp.lt.f32.partialorder %v73_v63, 0.0 }
  0x16   :  { %770 = vmatpush.xpose.msk.msra.mxu0 %vm84_vm0, %v46_v5  ;;  %807 = vmatpush.xpose.msk.msra.mxu2 %vm84_vm0, %v46_v5 }
  0x17   :  { %808 = vmatpush.xpose.msk.msra.mxu3 %vm84_vm0, %v46_v5 }
  0x1a   :  { %771 = vmatpush.xpose.msk.msra.mxu0 %vm84_vm0, %v45_v6  ;;  %809 = vmatpush.xpose.msk.msra.mxu2 %vm84_vm0, %v45_v6 }
  0x1b   :  { %810 = vmatpush.xpose.msk.msra.mxu3 %vm84_vm0, %v45_v6 }
  0x1e   :  { %772 = vmatpush.xpose.msk.msra.mxu0 %vm84_vm0, %v44_v7  ;;  %811 = vmatpush.xpose.msk.msra.mxu2 %vm84_vm0, %v44_v7 }
  0x1f   :  { %812 = vmatpush.xpose.msk.msra.mxu3 %vm84_vm0, %v44_v7 }
  0x22   :  { %773 = vmatpush.xpose.msk.msra.mxu0 %vm84_vm0, %v43_v8  ;;  %813 = vmatpush.xpose.msk.msra.mxu2 %vm84_vm0, %v43_v8 }
  0x23   :  { %814 = vmatpush.xpose.msk.msra.mxu3 %vm84_vm0, %v43_v8  ;;  %v78_v8 = vld [vmem:[%s1570_s3 + $0x50] sm:$0xff] }
  0x24   :  { %vm272_vm10 = vcmp.lt.f32.partialorder %v78_v8, 0.0 }
  0x26   :  { %774 = vmatpush.xpose.msk.msra.mxu0 %vm84_vm0, %v42_v9  ;;  %815 = vmatpush.xpose.msk.msra.mxu2 %vm84_vm0, %v42_v9 }
  0x27   :  { %816 = vmatpush.xpose.msk.msra.mxu3 %vm84_vm0, %v42_v9  ;;  %v82_v9 = vld [vmem:[%s1570_s3 + $0x70] sm:$0xff] }
  0x28   :  { %vm276_vm11 = vcmp.lt.f32.partialorder %v82_v9, 0.0 }
  0x2a   :  { %775 = vmatpush.xpose.msk.msra.mxu0 %vm84_vm0, %v41_v10  ;;  %817 = vmatpush.xpose.msk.msra.mxu2 %vm84_vm0, %v41_v10 }
  0x2b   :  { %818 = vmatpush.xpose.msk.msra.mxu3 %vm84_vm0, %v41_v10 }
  0x2e   :  { %776 = vmatpush.xpose.msk.msra.mxu0 %vm84_vm0, %v40_v11  ;;  %819 = vmatpush.xpose.msk.msra.mxu2 %vm84_vm0, %v40_v11 }
  0x2f   :  { %820 = vmatpush.xpose.msk.msra.mxu3 %vm84_vm0, %v40_v11 }
  0x32   :  { %777 = vmatpush.xpose.msk.msra.mxu0 %vm84_vm0, %v39_v12  ;;  %821 = vmatpush.xpose.msk.msra.mxu2 %vm84_vm0, %v39_v12 }
  0x33   :  { %822 = vmatpush.xpose.msk.msra.mxu3 %vm84_vm0, %v39_v12 }
  0x36   :  { %778 = vmatpush.xpose.msk.msra.mxu0 %vm84_vm0, %v38_v13  ;;  %823 = vmatpush.xpose.msk.msra.mxu2 %vm84_vm0, %v38_v13 }
  0x37   :  { %824 = vmatpush.xpose.msk.msra.mxu3 %vm84_vm0, %v38_v13 }
  0x3a   :  { %779 = vmatpush.xpose.msk.msra.mxu0 %vm84_vm0, %v37_v14  ;;  %825 = vmatpush.xpose.msk.msra.mxu2 %vm84_vm0, %v37_v14 }
  0x3b   :  { %826 = vmatpush.xpose.msk.msra.mxu3 %vm84_vm0, %v37_v14 }
  0x3e   :  { %780 = vmatpush.xpose.msk.msra.mxu0 %vm84_vm0, %v36_v15  ;;  %827 = vmatpush.xpose.msk.msra.mxu2 %vm84_vm0, %v36_v15 }
  0x3f   :  { %828 = vmatpush.xpose.msk.msra.mxu3 %vm84_vm0, %v36_v15  ;;  %v68_v15 = vld [vmem:[%s1570_s3] sm:$0xff] }
  0x40   :  { %vm262_vm12 = vcmp.lt.f32.partialorder %v68_v15, 0.0 }
  0x41   :  { %781 = vmatmul.msk.f32.vlgmr.msra.gmra.mxu0 %vm84_vm0, %v20_v16  ;;  %786 = vmatmul.msk.f32.vlgmr.msra.gmra.mxu2 %vm84_vm0, %v25_v17  ;;  %v79_v16 = vld [vmem:[%s1570_s3 + $0x58] sm:$0xff] }
  0x42   :  { %793 = vmatmul.msk.f32.vlgmr.msra.gmra.mxu3 %vm84_vm0, %v32_v18  ;;  %vm273_vm13 = vcmp.lt.f32.partialorder %v79_v16, 0.0 }
  0x49   :  { %782 = vmatmul.msk.f32.gmra.mxu0 %vm84_vm0, %v21_v19  ;;  %787 = vmatmul.msk.f32.gmra.mxu2 %vm84_vm0, %v26_v20 }
  0x4a   :  { %794 = vmatmul.msk.f32.gmra.mxu3 %vm84_vm0, %v33_v21 }
  0x51   :  { %783 = vmatmul.msk.f32.gmra.mxu0 %vm84_vm0, %v22_v22  ;;  %788 = vmatmul.msk.f32.gmra.mxu2 %vm84_vm0, %v27_v23  ;;  %v69_v22 = vld [vmem:[%s1570_s3 + $0x8] sm:$0xff] }
  0x52   :  { %795 = vmatmul.msk.f32.gmra.mxu3 %vm84_vm0, %v34_v24  ;;  %vm263_vm14 = vcmp.lt.f32.partialorder %v69_v22, 0.0 }
  0x59   :  { %784 = vmatmul.msk.f32.gmra.mxu0 %vm84_vm0, %v23_v25  ;;  %789 = vmatmul.msk.f32.gmra.mxu2 %vm84_vm0, %v28_v26 }
  0x5a   :  { %796 = vmatmul.msk.f32.gmra.mxu3 %vm84_vm0, %v35_v32 }
  0x61   :  { %785 = vmatmul.msk.f32.gmra.mxu0 %vm84_vm0, %v24_v27  ;;  %790 = vmatmul.msk.f32.gmra.mxu2 %vm84_vm0, %v29_v28 }
  0x69   :  { %791 = vmatmul.msk.f32.gmra.mxu2 %vm84_vm0, %v30_v29 }
  0x71   :  { %792 = vmatmul.msk.f32.gmra.mxu2 %vm84_vm0, %v31_v30 }
  0xbe   :  { %v1143_v31 = vpop.f32.mrf.mxu0 }
  0xbf   :  { %v246_v17 = vmul.f32 0.125, %v1143_v31 }
  0xc1   :  { %v1220_v20 = vsel %vm262_vm12, %v68_v15, %v246_v17 }
  0xc4   :  { %v213_v33 = vpop.f32.mrf.mxu2 }
  0xc5   :  { %v1169_v46 = vpop.f32.mrf.mxu3  ;;  %v251_v0 = vmul.f32 0.125, %v213_v33 }
  0xc6   :  { %v1149_v34 = vpop.f32.mrf.mxu0 }
  0xc7   :  { %v283_v6 = vsel %vm267_vm9, %v73_v63, %v251_v0  ;;  %v247_v23 = vmul.f32 0.125, %v1149_v34  ;;  %v66_v0 = vld [vmem:[%s1569_s2 + $0x70] sm:$0xff] }
  0xc9   :  { %v1230_v24 = vsel %vm263_vm14, %v69_v22, %v247_v23 }
  0xcc   :  { %v216_v37 = vpop.f32.mrf.mxu2 }
  0xcd   :  { %v252_v38 = vmul.f32 0.125, %v216_v37  ;;  %v237_v57 = vpop.f32.mrf.mxu3 }
  0xce   :  { %v204_v39 = vpop.f32.mrf.mxu0  ;;  %v259_v1 = vmul.f32 0.125, %v237_v57 }
  0xcf   :  { %v248_v40 = vmul.f32 0.125, %v204_v39  ;;  %v1157_v41 = vsel %vm268_vm1, %v74_v35, %v252_v38 }
  0xd0   :  { %306 = vmax.xlane.f32.xlu2 %v1157_v41  ;;  %v291_v5 = vsel %vm275_vm8, %v81_v62, %v259_v1 }
  0xd1   :  { %v1160_v42 = vsel %vm264_vm2, %v70_v36, %v248_v40 }
  0xd2   :  { %298 = vmax.xlane.f32.xlu0 %v1160_v42 }
  0xd4   :  { %v219_v45 = vpop.f32.mrf.mxu2 }
  0xd5   :  { %v253_v47 = vmul.f32 0.125, %v219_v45  ;;  %v240_v7 = vpop.f32.mrf.mxu3 }
  0xd6   :  { %v207_v48 = vpop.f32.mrf.mxu0  ;;  %v260_v10 = vmul.f32 0.125, %v240_v7 }
  0xd7   :  { %v249_v49 = vmul.f32 0.125, %v207_v48  ;;  %v1171_v50 = vsel %vm269_vm3, %v75_v43, %v253_v47 }
  0xd8   :  { %308 = vmax.xlane.f32.xlu2 %v1171_v50  ;;  %v1209_v14 = vsel %vm276_vm11, %v82_v9, %v260_v10  ;;  %v64_v9 = vld [vmem:[%s1569_s2 + $0x60] sm:$0xff] }
  0xd9   :  { %v1174_v51 = vsel %vm265_vm4, %v71_v44, %v249_v49 }
  0xda   :  { %300 = vmax.xlane.f32.xlu0 %v1174_v51 }
  0xdc   :  { %v222_v54 = vpop.f32.mrf.mxu2 }
  0xdd   :  { %v254_v55 = vmul.f32 0.125, %v222_v54 }
  0xde   :  { %v210_v56 = vpop.f32.mrf.mxu0 }
  0xdf   :  { %v250_v58 = vmul.f32 0.125, %v210_v56  ;;  %v1183_v59 = vsel %vm270_vm5, %v76_v52, %v254_v55 }
  0xe1   :  { %v1185_v60 = vsel %vm266_vm6, %v72_v53, %v250_v58  ;;  %v83_v53 = vld [vmem:[%s1570_s3 + $0x78] sm:$0xff] }
  0xe2   :  { %310 = vmax.xlane.f32.xlu0 %v1183_v59  ;;  %302 = vmax.xlane.f32.xlu1 %v1185_v60  ;;  %vm277_vm15 = vcmp.lt.f32.partialorder %v83_v53, 0.0 }
  0xe4   :  { %v225_v2 = vpop.f32.mrf.mxu2 }
  0xe5   :  { %v255_v3 = vmul.f32 0.125, %v225_v2 }
  0xe7   :  { %v1198_v4 = vsel %vm271_vm7, %v77_v61, %v255_v3 }
  0xe8   :  { %312 = vmax.xlane.f32.xlu2 %v1198_v4 }
  0xea   :  { %320 = vmax.xlane.f32.xlu0 %v291_v5  ;;  %304 = vmax.xlane.f32.xlu1 %v283_v6 }
  0xec   :  { %v228_v11 = vpop.f32.mrf.mxu2 }
  0xed   :  { %v256_v12 = vmul.f32 0.125, %v228_v11  ;;  %v63_v11 = vld [vmem:[%s1569_s2 + $0x58] sm:$0xff] }
  0xef   :  { %v1207_v13 = vsel %vm272_vm10, %v78_v8, %v256_v12 }
  0xf0   :  { %314 = vmax.xlane.f32.xlu2 %v1207_v13 }
  0xf2   :  { %322 = vmax.xlane.f32.xlu0 %v1209_v14 }
  0xf4   :  { %v231_v18 = vpop.f32.mrf.mxu2 }
  0xf5   :  { %v257_v19 = vmul.f32 0.125, %v231_v18 }
  0xf7   :  { %v1222_v21 = vsel %vm273_vm13, %v79_v16, %v257_v19  ;;  %v62_v16 = vld [vmem:[%s1569_s2 + $0x50] sm:$0xff] }
  0xf8   :  { %294 = vmax.xlane.f32.xlu2 %v1220_v20 }
  0xfa   :  { %316 = vmax.xlane.f32.xlu0 %v1222_v21 }
 0x102   :  { %296 = vmax.xlane.f32.xlu0 %v1230_v24 }
 0x143   :  { %v307_v25 = vpop.xlane.xlu2 %306 }
 0x144   :  { %v332_v54 = vsub.f32 %v1157_v41, %v307_v25  ;;  %v67_v41 = vld [vmem:[%s1569_s2 + $0x78] sm:$0xff] }
 0x145   :  { %v299_v26 = vpop.xlane.xlu0 %298  ;;  %829 = vmatpush.msra.mxu1 %v67_v41  ;;  %830 = vmatpush.msrb.mxu3 %v67_v41 }
 0x146   :  { %v328_v27 = vsub.f32 %v1160_v42, %v299_v26  ;;  %v354_v58 = vmul.f32 1.442695, %v332_v54  ;;  %662 = vmatpush.msrb.mxu0 %v67_v41 }
 0x147   :  { %831 = vmatpush.msra.mxu1 %v66_v0  ;;  %832 = vmatpush.msrb.mxu3 %v66_v0 }
 0x148   :  { %v346_v28 = vmul.f32 1.442695, %v328_v27  ;;  %663 = vmatpush.msrb.mxu0 %v66_v0 }
 0x14a   :  { %864 = vpow2.f32 %v346_v28 }
 0x14b   :  { %v309_v29 = vpop.xlane.xlu2 %308 }
 0x14c   :  { %v333_v30 = vsub.f32 %v1171_v50, %v309_v29 }
 0x14d   :  { %v301_v31 = vpop.xlane.xlu0 %300 }
 0x14e   :  { %v356_v32 = vmul.f32 1.442695, %v333_v30  ;;  %v329_v33 = vsub.f32 %v1174_v51, %v301_v31  ;;  %v243_v51 = vpop.f32.mrf.mxu3  ;;  %v60_v31 = vld [vmem:[%s1569_s2 + $0x40] sm:$0xff] }
 0x14f   :  { %v261_v56 = vmul.f32 0.125, %v243_v51 }
 0x150   :  { %v1236_v35 = vpop.eup %864  ;;  %866 = vpow2.f32 %v356_v32  ;;  %v348_v34 = vmul.f32 1.442695, %v329_v33  ;;  %v59_v32 = vld [vmem:[%s1569_s2 + $0x38] sm:$0xff]  ;;  %v58_v33 = vld [vmem:[%s1569_s2 + $0x30] sm:$0xff] }
 0x151   :  { %378 = vadd.xlane.f32.xlu1 %v1236_v35 }
 0x152   :  { %868 = vpow2.f32 %v348_v34  ;;  %v57_v34 = vld [vmem:[%s1569_s2 + $0x28] sm:$0xff] }
 0x155   :  { %v311_v36 = vpop.xlane.xlu0 %310  ;;  %v303_v37 = vpop.xlane.xlu1 %302 }
 0x156   :  { %v1239_v38 = vpop.eup %866  ;;  %v330_v39 = vsub.f32 %v1185_v60, %v303_v37  ;;  %v1253_v60 = vsel %vm277_vm15, %v83_v53, %v261_v56  ;;  %v334_v63 = vsub.f32 %v1183_v59, %v311_v36  ;;  %v80_v59 = vld [vmem:[%s1570_s3 + $0x60] sm:$0xff]  ;;  %v55_v37 = vld [vmem:[%s1569_s2 + $0x18] sm:$0xff] }
 0x157   :  { %388 = vadd.xlane.f32.xlu0 %v1239_v38  ;;  %vm274_vm1 = vcmp.lt.f32.partialorder %v80_v59, 0.0  ;;  %v56_v36 = vld [vmem:[%s1569_s2 + $0x20] sm:$0xff] }
 0x158   :  { %v1243_v40 = vpop.eup %868  ;;  %v350_v42 = vmul.f32 1.442695, %v330_v39  ;;  %v54_v39 = vld [vmem:[%s1569_s2 + $0x10] sm:$0xff] }
 0x159   :  { %380 = vadd.xlane.f32.xlu1 %v1243_v40 }
 0x15a   :  { %870 = vpow2.f32 %v350_v42  ;;  %v53_v42 = vld [vmem:[%s1569_s2 + $0x8] sm:$0xff] }
 0x15b   :  { %v313_v43 = vpop.xlane.xlu2 %312 }
 0x15c   :  { %v335_v1 = vsub.f32 %v1198_v4, %v313_v43  ;;  %v358_v4 = vmul.f32 1.442695, %v334_v63  ;;  %v52_v43 = vld [vmem:[%s1569_s2] sm:$0xff] }
 0x15d   :  { %v321_v44 = vpop.xlane.xlu0 %320  ;;  %v305_v45 = vpop.xlane.xlu1 %304 }
 0x15e   :  { %v339_v47 = vsub.f32 %v291_v5, %v321_v44  ;;  %v331_v48 = vsub.f32 %v283_v6, %v305_v45  ;;  %v65_v5 = vld [vmem:[%s1569_s2 + $0x68] sm:$0xff]  ;;  %v258_v6 = vmul.f32 0.125, %v1169_v46  ;;  %v360_v10 = vmul.f32 1.442695, %v335_v1 }
 0x15f   :  { %833 = vmatpush.msra.mxu1 %v65_v5  ;;  %834 = vmatpush.msrb.mxu3 %v65_v5 }
 0x160   :  { %v368_v49 = vmul.f32 1.442695, %v339_v47  ;;  %v352_v50 = vmul.f32 1.442695, %v331_v48  ;;  %v1246_v52 = vpop.eup %870  ;;  %664 = vmatpush.msrb.mxu0 %v65_v5  ;;  %v1287_v15 = vsel %vm274_vm1, %v80_v59, %v258_v6 }
 0x161   :  { %382 = vadd.xlane.f32.xlu1 %v1246_v52  ;;  %835 = vmatpush.msra.mxu1 %v64_v9 }
 0x162   :  { %872 = vpow2.f32 %v368_v49  ;;  %836 = vmatpush.msrb.mxu3 %v64_v9  ;;  %665 = vmatpush.msrb.mxu0 %v64_v9 }
 0x163   :  { %874 = vpow2.f32 %v352_v50  ;;  %v315_v55 = vpop.xlane.xlu2 %314  ;;  %837 = vmatpush.msra.mxu1 %v63_v11 }
 0x164   :  { %876 = vpow2.f32 %v354_v58  ;;  %v336_v12 = vsub.f32 %v1207_v13, %v315_v55  ;;  %838 = vmatpush.msrb.mxu3 %v63_v11  ;;  %666 = vmatpush.msrb.mxu0 %v63_v11 }
 0x165   :  { %v323_v57 = vpop.xlane.xlu0 %322  ;;  %839 = vmatpush.msra.mxu1 %v62_v16 }
 0x166   :  { %v340_v17 = vsub.f32 %v1209_v14, %v323_v57  ;;  %v362_v13 = vmul.f32 1.442695, %v336_v12  ;;  %840 = vmatpush.msrb.mxu3 %v62_v16  ;;  %667 = vmatpush.msrb.mxu0 %v62_v16 }
 0x168   :  { %v1255_v61 = vpop.eup %872  ;;  %v370_v22 = vmul.f32 1.442695, %v340_v17 }
 0x169   :  { %v1257_v62 = vpop.eup %874  ;;  %400 = vadd.xlane.f32.xlu0 %v1255_v61  ;;  %324 = vmax.xlane.f32.xlu1 %v1253_v60 }
 0x16a   :  { %384 = vadd.xlane.f32.xlu2 %v1257_v62  ;;  %v1284_v46 = vpop.eup %876 }
 0x16b   :  { %v295_v2 = vpop.xlane.xlu2 %294 }
 0x16c   :  { %v326_v3 = vsub.f32 %v1220_v20, %v295_v2 }
 0x16d   :  { %v317_v7 = vpop.xlane.xlu0 %316 }
 0x16e   :  { %v342_v8 = vmul.f32 1.442695, %v326_v3  ;;  %v337_v26 = vsub.f32 %v1222_v21, %v317_v7  ;;  %v61_v21 = vld [vmem:[%s1569_s2 + $0x48] sm:$0xff] }
 0x16f   :  { %841 = vmatpush.msra.mxu1 %v61_v21  ;;  %842 = vmatpush.msrb.mxu3 %v61_v21 }
 0x170   :  { %878 = vpow2.f32 %v342_v8  ;;  %v364_v27 = vmul.f32 1.442695, %v337_v26  ;;  %668 = vmatpush.msrb.mxu0 %v61_v21 }
 0x171   :  { %880 = vpow2.f32 %v358_v4  ;;  %318 = vmax.xlane.f32.xlu1 %v1287_v15  ;;  %843 = vmatpush.msra.mxu1 %v60_v31 }
 0x172   :  { %386 = vadd.xlane.f32.xlu2 %v1284_v46  ;;  %882 = vpow2.f32 %v360_v10  ;;  %844 = vmatpush.msrb.mxu3 %v60_v31 }
 0x173   :  { %884 = vpow2.f32 %v362_v13  ;;  %669 = vmatpush.msrb.mxu0 %v60_v31  ;;  %845 = vmatpush.msra.mxu1 %v59_v32 }
 0x174   :  { %846 = vmatpush.msrb.mxu3 %v59_v32 }
 0x175   :  { %v297_v18 = vpop.xlane.xlu0 %296  ;;  %670 = vmatpush.msrb.mxu0 %v59_v32  ;;  %847 = vmatpush.msra.mxu1 %v58_v33 }
 0x176   :  { %v1295_v19 = vpop.eup %878  ;;  %v327_v20 = vsub.f32 %v1230_v24, %v297_v18  ;;  %848 = vmatpush.msrb.mxu3 %v58_v33 }
 0x177   :  { %374 = vadd.xlane.f32.xlu0 %v1295_v19  ;;  %v1299_v23 = vpop.eup %880  ;;  %671 = vmatpush.msrb.mxu0 %v58_v33 }
 0x178   :  { %v344_v25 = vmul.f32 1.442695, %v327_v20  ;;  %v1301_v14 = vpop.eup %882  ;;  %849 = vmatpush.msra.mxu1 %v57_v34  ;;  %850 = vmatpush.msrb.mxu3 %v57_v34 }
 0x179   :  { %390 = vadd.xlane.f32.xlu1 %v1299_v23  ;;  %v1306_v24 = vpop.eup %884  ;;  %672 = vmatpush.msrb.mxu0 %v57_v34 }
 0x17a   :  { %886 = vpow2.f32 %v344_v25  ;;  %392 = vadd.xlane.f32.xlu2 %v1301_v14  ;;  %851 = vmatpush.msra.mxu1 %v56_v36 }
 0x17b   :  { %888 = vpow2.f32 %v370_v22  ;;  %852 = vmatpush.msrb.mxu3 %v56_v36  ;;  %673 = vmatpush.msrb.mxu0 %v56_v36 }
 0x17c   :  { %890 = vpow2.f32 %v364_v27  ;;  %853 = vmatpush.msra.mxu1 %v55_v37 }
 0x17d   :  { %854 = vmatpush.msrb.mxu3 %v55_v37  ;;  %674 = vmatpush.msrb.mxu0 %v55_v37 }
 0x17e   :  { %855 = vmatpush.msra.mxu1 %v54_v39 }
 0x17f   :  { %856 = vmatpush.msrb.mxu3 %v54_v39  ;;  %675 = vmatpush.msrb.mxu0 %v54_v39 }
 0x180   :  { %v1308_v28 = vpop.eup %886  ;;  %857 = vmatpush.msra.mxu1 %v53_v42 }
 0x181   :  { %v1310_v29 = vpop.eup %888  ;;  %376 = vadd.xlane.f32.xlu0 %v1308_v28  ;;  %394 = vadd.xlane.f32.xlu1 %v1306_v24 }
 0x182   :  { %402 = vadd.xlane.f32.xlu2 %v1310_v29  ;;  %v1315_v30 = vpop.eup %890  ;;  %858 = vmatpush.msrb.mxu3 %v53_v42 }
 0x183   :  { %676 = vmatpush.msrb.mxu0 %v53_v42  ;;  %859 = vmatpush.msra.mxu1 %v52_v43 }
 0x184   :  { %860 = vmatpush.msrb.mxu3 %v52_v43 }
 0x185   :  { %677 = vmatpush.msrb.mxu0 %v52_v43 }
 0x189   :  { %396 = vadd.xlane.f32.xlu1 %v1315_v30 }
 0x1c4   :  { %v379_v44 = vpop.xlane.xlu1 %378 }
 0x1c5   :  { %892 = vrcp.f32 %v379_v44  ;;  %v447_v51 = vand.u32 2147483648, %v379_v44  ;;  %v445_v54 = vand.u32 2147483647, %v379_v44  ;;  %vm441_vm3 = vweird.f32 %v379_v44 }
 0x1c7   :  { %v448_v63 = vor.u32 1.1754944e-38, %v447_v51  ;;  %vm446_vm5 = vcmp.eq.f32.partialorder %v445_v54, 8.507059e+37 }
 0x1ca   :  { %v389_v45 = vpop.xlane.xlu0 %388 }
 0x1cb   :  { %v893_v47 = vpop.eup %892  ;;  %894 = vrcp.f32 %v389_v45  ;;  %v520_v3 = vand.u32 2147483647, %v389_v45  ;;  %v522_v5 = vand.u32 2147483648, %v389_v45  ;;  %vm516_vm7 = vweird.f32 %v389_v45 }
 0x1cc   :  { %v437_v48 = vmul.f32 %v893_v47, %v379_v44  ;;  %v381_v49 = vpop.xlane.xlu1 %380  ;;  %vm442_vm2 = vweird.f32 %v893_v47 }
 0x1cd   :  { %896 = vrcp.f32 %v381_v49  ;;  %vm443_vm4 = vmor %vm441_vm3, %vm442_vm2  ;;  %v462_v9 = vand.u32 2147483648, %v381_v49  ;;  %v460_v11 = vand.u32 2147483647, %v381_v49  ;;  %v523_v12 = vor.u32 1.1754944e-38, %v522_v5 }
 0x1ce   :  { %v438_v50 = vsub.f32 1.0, %v437_v48  ;;  %vm456_vm10 = vweird.f32 %v381_v49  ;;  %vm521_vm11 = vcmp.eq.f32.partialorder %v520_v3, 8.507059e+37 }
 0x1cf   :  { %v463_v22 = vor.u32 1.1754944e-38, %v462_v9  ;;  %vm461_vm13 = vcmp.eq.f32.partialorder %v460_v11, 8.507059e+37 }
 0x1d0   :  { %v439_v53 = vmul.f32 %v893_v47, %v438_v50 }
 0x1d1   :  { %v895_v55 = vpop.eup %894 }
 0x1d2   :  { %v512_v56 = vmul.f32 %v895_v55, %v389_v45  ;;  %v440_v57 = vadd.f32 %v893_v47, %v439_v53  ;;  %vm517_vm6 = vweird.f32 %v895_v55 }
 0x1d3   :  { %v897_v58 = vpop.eup %896  ;;  %vm518_vm9 = vmor %vm516_vm7, %vm517_vm6 }
 0x1d4   :  { %v513_v41 = vsub.f32 1.0, %v512_v56  ;;  %v452_v0 = vmul.f32 %v897_v58, %v381_v49  ;;  %v444_v1 = vsel %vm443_vm4, %v893_v47, %v440_v57  ;;  %v383_v2 = vpop.xlane.xlu1 %382  ;;  %vm457_vm8 = vweird.f32 %v897_v58 }
 0x1d5   :  { %v449_v59 = vsel %vm446_vm5, %v448_v63, %v444_v1  ;;  %898 = vrcp.f32 %v383_v2  ;;  %vm458_vm12 = vmor %vm456_vm10, %vm457_vm8  ;;  %v477_v36 = vand.u32 2147483648, %v383_v2  ;;  %v475_v39 = vand.u32 2147483647, %v383_v2 }
 0x1d6   :  { %v514_v6 = vmul.f32 %v895_v55, %v513_v41  ;;  %v453_v7 = vsub.f32 1.0, %v452_v0  ;;  %v450_v4 = vmul.f32 %v1236_v35, %v449_v59  ;;  %vm471_vm15 = vweird.f32 %v383_v2 }
 0x1d7   :  { %v478_v45 = vor.u32 1.1754944e-38, %v477_v36  ;;  %vm476_vm2 = vcmp.eq.f32.partialorder %v475_v39, 8.507059e+37 }
 0x1d8   :  { %v454_v8 = vmul.f32 %v897_v58, %v453_v7  ;;  %648 = vst [vmem:[%s1572_s5 + $0x10] sm:$0xff] %v450_v4  ;;  %684 = vmatmul.f32.vlgmr.msra.gmra.mxu1 %v450_v4  ;;  %v515_v10 = vadd.f32 %v895_v55, %v514_v6 }
 0x1da   :  { %v455_v16 = vadd.f32 %v897_v58, %v454_v8  ;;  %v519_v17 = vsel %vm518_vm9, %v895_v55, %v515_v10 }
 0x1db   :  { %v524_v35 = vsel %vm521_vm11, %v523_v12, %v519_v17  ;;  %v899_v13 = vpop.eup %898 }
 0x1dc   :  { %v1353_v18 = vpop.xlane.xlu0 %400  ;;  %v459_v20 = vsel %vm458_vm12, %v897_v58, %v455_v16  ;;  %v1356_v25 = vmul.f32 %v1239_v38, %v524_v35  ;;  %v467_v26 = vmul.f32 %v899_v13, %v383_v2  ;;  %v325_v21 = vpop.xlane.xlu1 %324  ;;  %vm472_vm14 = vweird.f32 %v899_v13 }
 0x1dd   :  { %900 = vrcp.f32 %v1353_v18  ;;  %v385_v27 = vpop.xlane.xlu2 %384  ;;  %v341_v31 = vsub.f32 %v1253_v60, %v325_v21  ;;  %v464_v32 = vsel %vm461_vm13, %v463_v22, %v459_v20  ;;  %vm473_vm1 = vmor %vm471_vm15, %vm472_vm14  ;;  %v610_v1 = vand.u32 2147483647, %v1353_v18 }
 0x1de   :  { %902 = vrcp.f32 %v385_v27  ;;  %653 = vst [vmem:[%s1572_s5 + $0x38] sm:$0xff] %v1356_v25  ;;  %v468_v33 = vsub.f32 1.0, %v467_v26  ;;  %v465_v34 = vmul.f32 %v1243_v40, %v464_v32  ;;  %v612_v40 = vand.u32 2147483648, %v1353_v18 }
 0x1df   :  { %v372_v38 = vmul.f32 1.442695, %v341_v31  ;;  %v490_v57 = vand.u32 2147483647, %v385_v27  ;;  %v492_v58 = vand.u32 2147483648, %v385_v27  ;;  %vm606_vm5 = vweird.f32 %v1353_v18 }
 0x1e0   :  { %v469_v37 = vmul.f32 %v899_v13, %v468_v33  ;;  %649 = vst [vmem:[%s1572_s5 + $0x18] sm:$0xff] %v465_v34  ;;  %687 = vmatmul.f32.gmra.mxu1 %v465_v34  ;;  %vm486_vm6 = vweird.f32 %v385_v27  ;;  %vm611_vm10 = vcmp.eq.f32.partialorder %v610_v1, 8.507059e+37 }
 0x1e1   :  { %904 = vpow2.f32 %v372_v38  ;;  %vm1386_vm7 = vcmp.eq.f32.partialorder %v490_v57, 8.507059e+37  ;;  %v493_v7 = vor.u32 1.1754944e-38, %v492_v58 }
 0x1e2   :  { %v470_v42 = vadd.f32 %v899_v13, %v469_v37 }
 0x1e3   :  { %v901_v60 = vpop.eup %900 }
 0x1e4   :  { %v903_v43 = vpop.eup %902  ;;  %v602_v44 = vmul.f32 %v901_v60, %v1353_v18  ;;  %v319_v49 = vpop.xlane.xlu1 %318  ;;  %v474_v50 = vsel %vm473_vm1, %v899_v13, %v470_v42  ;;  %vm607_vm3 = vweird.f32 %v901_v60 }
 0x1e5   :  { %v482_v47 = vmul.f32 %v903_v43, %v385_v27  ;;  %v1370_v48 = vpop.xlane.xlu2 %386  ;;  %v338_v53 = vsub.f32 %v1287_v15, %v319_v49  ;;  %v479_v54 = vsel %vm476_vm2, %v478_v45, %v474_v50  ;;  %vm487_vm4 = vweird.f32 %v903_v43  ;;  %vm608_vm8 = vmor %vm606_vm5, %vm607_vm3 }
 0x1e6   :  { %v603_v51 = vsub.f32 1.0, %v602_v44  ;;  %906 = vrcp.f32 %v1370_v48  ;;  %v480_v56 = vmul.f32 %v1246_v52, %v479_v54  ;;  %v613_v52 = vor.u32 1.1754944e-38, %v612_v40  ;;  %vm488_vm9 = vmor %vm486_vm6, %vm487_vm4 }
 0x1e7   :  { %v483_v55 = vsub.f32 1.0, %v482_v47  ;;  %v1375_v63 = vpop.eup %904  ;;  %v366_v0 = vmul.f32 1.442695, %v338_v53  ;;  %v505_v8 = vand.u32 2147483647, %v1370_v48  ;;  %v507_v17 = vand.u32 2147483648, %v1370_v48 }
 0x1e8   :  { %v604_v41 = vmul.f32 %v901_v60, %v603_v51  ;;  %650 = vst [vmem:[%s1572_s5 + $0x20] sm:$0xff] %v480_v56  ;;  %690 = vmatmul.f32.gmra.mxu1 %v480_v56  ;;  %404 = vadd.xlane.f32.xlu2 %v1375_v63  ;;  %vm501_vm11 = vweird.f32 %v1370_v48 }
 0x1e9   :  { %v484_v2 = vmul.f32 %v903_v43, %v483_v55  ;;  %908 = vpow2.f32 %v366_v0  ;;  %vm1417_vm13 = vcmp.eq.f32.partialorder %v505_v8, 8.507059e+37  ;;  %v508_v32 = vor.u32 1.1754944e-38, %v507_v17 }
 0x1ea   :  { %v1383_v15 = vpop.xlane.xlu0 %374  ;;  %v605_v59 = vadd.f32 %v901_v60, %v604_v41 }
 0x1eb   :  { %910 = vrcp.f32 %v1383_v15  ;;  %v485_v3 = vadd.f32 %v903_v43, %v484_v2  ;;  %v417_v35 = vand.u32 2147483648, %v1383_v15  ;;  %v415_v26 = vand.u32 2147483647, %v1383_v15 }
 0x1ec   :  { %v907_v6 = vpop.eup %906  ;;  %v609_v4 = vsel %vm608_vm8, %v901_v60, %v605_v59  ;;  %v1395_v11 = vpop.xlane.xlu1 %390  ;;  %vm411_vm14 = vweird.f32 %v1383_v15 }
 0x1ed   :  { %v497_v9 = vmul.f32 %v907_v6, %v1370_v48  ;;  %v1393_v10 = vpop.xlane.xlu2 %392  ;;  %v489_v12 = vsel %vm488_vm9, %v903_v43, %v485_v3  ;;  %v614_v16 = vsel %vm611_vm10, %v613_v52, %v609_v4  ;;  %vm502_vm12 = vweird.f32 %v907_v6 }
 0x1ee   :  { %912 = vrcp.f32 %v1393_v10  ;;  %v494_v13 = vsel %vm1386_vm7, %v493_v7, %v489_v12  ;;  %v615_v18 = vmul.f32 %v1255_v61, %v614_v16  ;;  %v418_v33 = vor.u32 1.1754944e-38, %v417_v35  ;;  %vm503_vm2 = vmor %vm501_vm11, %vm502_vm12 }
 0x1ef   :  { %v498_v20 = vsub.f32 1.0, %v497_v9  ;;  %914 = vrcp.f32 %v1395_v11  ;;  %v495_v22 = vmul.f32 %v1257_v62, %v494_v13  ;;  %v1406_v27 = vpop.eup %908  ;;  %vm1422_vm15 = vcmp.eq.f32.partialorder %v415_v26, 8.507059e+37 }
 0x1f0   :  { %659 = vst [vmem:[%s1572_s5 + $0x68] sm:$0xff] %v615_v18  ;;  %717 = vmatmul.f32.vlgmr.msrb.gmra.mxu3 %v615_v18  ;;  %398 = vadd.xlane.f32.xlu1 %v1406_v27  ;;  %vm531_vm1 = vweird.f32 %v1395_v11  ;;  %v535_v60 = vand.u32 2147483647, %v1395_v11  ;;  %v537_v42 = vand.u32 2147483648, %v1395_v11  ;;  %v550_v43 = vand.u32 2147483647, %v1393_v10 }
 0x1f1   :  { %v911_v21 = vpop.eup %910  ;;  %v499_v31 = vmul.f32 %v907_v6, %v498_v20  ;;  %651 = vst [vmem:[%s1572_s5 + $0x28] sm:$0xff] %v495_v22  ;;  %693 = vmatmul.f32.gmra.mxu1 %v495_v22  ;;  %v552_v49 = vand.u32 2147483648, %v1393_v10  ;;  %vm546_vm4 = vweird.f32 %v1393_v10 }
 0x1f2   :  { %v407_v61 = vmul.f32 %v911_v21, %v1383_v15  ;;  %vm412_vm3 = vweird.f32 %v911_v21  ;;  %vm1452_vm5 = vcmp.eq.f32.partialorder %v535_v60, 8.507059e+37  ;;  %v538_v0 = vor.u32 1.1754944e-38, %v537_v42 }
 0x1f3   :  { %v500_v34 = vadd.f32 %v907_v6, %v499_v31  ;;  %vm413_vm6 = vmor %vm411_vm14, %vm412_vm3  ;;  %vm1460_vm7 = vcmp.eq.f32.partialorder %v550_v43, 8.507059e+37  ;;  %v553_v2 = vor.u32 1.1754944e-38, %v552_v49 }
 0x1f4   :  { %v1426_v36 = vpop.eup %912  ;;  %v408_v37 = vsub.f32 1.0, %v407_v61  ;;  %v1428_v39 = vpop.xlane.xlu0 %376 }
 0x1f5   :  { %v915_v44 = vpop.eup %914  ;;  %v542_v45 = vmul.f32 %v1426_v36, %v1393_v10  ;;  %916 = vrcp.f32 %v1428_v39  ;;  %v1437_v40 = vpop.xlane.xlu2 %402  ;;  %v504_v53 = vsel %vm503_vm2, %v907_v6, %v500_v34  ;;  %vm426_vm8 = vweird.f32 %v1428_v39 }
 0x1f6   :  { %v1439_v47 = vpop.xlane.xlu1 %394  ;;  %v409_v50 = vmul.f32 %v911_v21, %v408_v37  ;;  %v527_v51 = vmul.f32 %v915_v44, %v1395_v11  ;;  %918 = vrcp.f32 %v1437_v40  ;;  %v509_v55 = vsel %vm1417_vm13, %v508_v32, %v504_v53 }
 0x1f7   :  { %v543_v54 = vsub.f32 1.0, %v542_v45  ;;  %920 = vrcp.f32 %v1439_v47  ;;  %v510_v48 = vmul.f32 %v1284_v46, %v509_v55  ;;  %vm532_vm9 = vweird.f32 %v915_v44 }
 0x1f8   :  { %v528_v56 = vsub.f32 1.0, %v527_v51  ;;  %v410_v57 = vadd.f32 %v911_v21, %v409_v50  ;;  %v432_v15 = vand.u32 2147483648, %v1428_v39  ;;  %vm547_vm10 = vweird.f32 %v1426_v36  ;;  %vm533_vm12 = vmor %vm531_vm1, %vm532_vm9 }
 0x1f9   :  { %v544_v41 = vmul.f32 %v1426_v36, %v543_v54  ;;  %652 = vst [vmem:[%s1572_s5 + $0x30] sm:$0xff] %v510_v48  ;;  %696 = vmatmul.f32.gmra.mxu1 %v510_v48  ;;  %v430_v8 = vand.u32 2147483647, %v1428_v39  ;;  %vm1478_vm11 = vmor %vm546_vm4, %vm547_vm10  ;;  %v627_v13 = vand.u32 2147483648, %v1437_v40  ;;  %v567_v38 = vand.u32 2147483648, %v1439_v47 }
 0x1fa   :  { %v529_v52 = vmul.f32 %v915_v44, %v528_v56  ;;  %v414_v46 = vsel %vm413_vm6, %v911_v21, %v410_v57  ;;  %v565_v60 = vand.u32 2147483647, %v1439_v47  ;;  %vm621_vm3 = vweird.f32 %v1437_v40 }
 0x1fb   :  { %v917_v59 = vpop.eup %916  ;;  %v419_v3 = vsel %vm1422_vm15, %v418_v33, %v414_v46  ;;  %v545_v5 = vadd.f32 %v1426_v36, %v544_v41  ;;  %v433_v33 = vor.u32 1.1754944e-38, %v432_v15  ;;  %vm431_vm2 = vcmp.eq.f32.partialorder %v430_v8, 8.507059e+37 }
 0x1fc   :  { %v919_v6 = vpop.eup %918  ;;  %v422_v7 = vmul.f32 %v917_v59, %v1428_v39  ;;  %v420_v4 = vmul.f32 %v1295_v19, %v419_v3  ;;  %v530_v9 = vadd.f32 %v915_v44, %v529_v52  ;;  %v625_v19 = vand.u32 2147483647, %v1437_v40 }
 0x1fd   :  { %v921_v16 = vpop.eup %920  ;;  %v617_v17 = vmul.f32 %v919_v6, %v1437_v40  ;;  %v549_v10 = vsel %vm1478_vm11, %v1426_v36, %v545_v5  ;;  %vm427_vm13 = vweird.f32 %v917_v59  ;;  %vm622_vm14 = vweird.f32 %v919_v6 }
 0x1fe   :  { %v1483_v35 = vpop.xlane.xlu1 %396  ;;  %v423_v18 = vsub.f32 1.0, %v422_v7  ;;  %v557_v20 = vmul.f32 %v921_v16, %v1439_v47  ;;  %646 = vst [vmem:[%s1572_s5] sm:$0xff] %v420_v4  ;;  %678 = vmatmul.f32.vlgmr.msrb.gmra.mxu0 %v420_v4  ;;  %v534_v11 = vsel %vm533_vm12, %v915_v44, %v530_v9  ;;  %v554_v21 = vsel %vm1460_vm7, %v553_v2, %v549_v10  ;;  %vm428_vm1 = vmor %vm426_vm8, %vm427_vm13 }
 0x1ff   :  { %922 = vrcp.f32 %v1483_v35  ;;  %v618_v22 = vsub.f32 1.0, %v617_v17  ;;  %v539_v26 = vsel %vm1452_vm5, %v538_v0, %v534_v11  ;;  %v555_v32 = vmul.f32 %v1301_v14, %v554_v21  ;;  %vm623_vm5 = vmor %vm621_vm3, %vm622_vm14 }
 0x200   :  { %v424_v31 = vmul.f32 %v917_v59, %v423_v18  ;;  %v558_v61 = vsub.f32 1.0, %v557_v20  ;;  %v540_v62 = vmul.f32 %v1299_v23, %v539_v26  ;;  %vm562_vm15 = vweird.f32 %v921_v16 }
 0x201   :  { %v619_v34 = vmul.f32 %v919_v6, %v618_v22  ;;  %699 = vmatmul.f32.gmra.mxu1 %v1356_v25  ;;  %vm626_vm4 = vcmp.eq.f32.partialorder %v625_v19, 8.507059e+37  ;;  %655 = vst [vmem:[%s1572_s5 + $0x48] sm:$0xff] %v555_v32  ;;  %v628_v42 = vor.u32 1.1754944e-38, %v627_v13  ;;  %vm561_vm6 = vweird.f32 %v1439_v47 }
 0x202   :  { %v559_v36 = vmul.f32 %v921_v16, %v558_v61  ;;  %v425_v37 = vadd.f32 %v917_v59, %v424_v31  ;;  %654 = vst [vmem:[%s1572_s5 + $0x40] sm:$0xff] %v540_v62  ;;  %vm563_vm7 = vmor %vm561_vm6, %vm562_vm15  ;;  %v568_v40 = vor.u32 1.1754944e-38, %v567_v38  ;;  %vm566_vm8 = vcmp.eq.f32.partialorder %v565_v60, 8.507059e+37 }
 0x203   :  { %v620_v23 = vadd.f32 %v919_v6, %v619_v34  ;;  %v582_v56 = vand.u32 2147483648, %v1483_v35  ;;  %vm576_vm10 = vweird.f32 %v1483_v35 }
 0x204   :  { %v429_v25 = vsel %vm428_vm1, %v917_v59, %v425_v37  ;;  %v560_v43 = vadd.f32 %v921_v16, %v559_v36 }
 0x205   :  { %v923_v14 = vpop.eup %922  ;;  %v434_v44 = vsel %vm431_vm2, %v433_v33, %v429_v25  ;;  %v624_v45 = vsel %vm623_vm5, %v919_v6, %v620_v23 }
 0x206   :  { %v572_v39 = vmul.f32 %v923_v14, %v1483_v35  ;;  %v435_v49 = vmul.f32 %v1308_v28, %v434_v44  ;;  %v629_v50 = vsel %vm626_vm4, %v628_v42, %v624_v45  ;;  %v564_v51 = vsel %vm563_vm7, %v921_v16, %v560_v43 }
 0x207   :  { %v630_v54 = vmul.f32 %v1310_v29, %v629_v50  ;;  %v569_v55 = vsel %vm566_vm8, %v568_v40, %v564_v51  ;;  %vm577_vm9 = vweird.f32 %v923_v14  ;;  %v580_v28 = vand.u32 2147483647, %v1483_v35 }
 0x208   :  { %v573_v53 = vsub.f32 1.0, %v572_v39  ;;  %647 = vst [vmem:[%s1572_s5 + $0x8] sm:$0xff] %v435_v49  ;;  %681 = vmatmul.f32.gmra.mxu0 %v435_v49  ;;  %v570_v47 = vmul.f32 %v1306_v24, %v569_v55  ;;  %vm578_vm11 = vmor %vm576_vm10, %vm577_vm9  ;;  %v583_v24 = vor.u32 1.1754944e-38, %v582_v56 }
 0x209   :  { %660 = vst [vmem:[%s1572_s5 + $0x70] sm:$0xff] %v630_v54  ;;  %720 = vmatmul.f32.gmra.mxu3 %v630_v54  ;;  %702 = vmatmul.f32.gmra.mxu1 %v540_v62  ;;  %vm581_vm12 = vcmp.eq.f32.partialorder %v580_v28, 8.507059e+37 }
 0x20a   :  { %v574_v48 = vmul.f32 %v923_v14, %v573_v53  ;;  %656 = vst [vmem:[%s1572_s5 + $0x50] sm:$0xff] %v570_v47 }
 0x20c   :  { %v575_v29 = vadd.f32 %v923_v14, %v574_v48 }
 0x20e   :  { %v579_v57 = vsel %vm578_vm11, %v923_v14, %v575_v29 }
 0x20f   :  { %v584_v58 = vsel %vm581_vm12, %v583_v24, %v579_v57 }
 0x210   :  { %v585_v41 = vmul.f32 %v1315_v30, %v584_v58 }
 0x211   :  { %705 = vmatmul.f32.gmra.mxu1 %v555_v32 }
 0x212   :  { %657 = vst [vmem:[%s1572_s5 + $0x58] sm:$0xff] %v585_v41 }
 0x219   :  { %708 = vmatmul.f32.gmra.mxu1 %v570_v47 }
 0x221   :  { %711 = vmatmul.f32.gmra.mxu1 %v585_v41 }
 0x255   :  { %v685_v0 = vpop.f32.mrf.mxu1 }
 0x256   :  { %729 = vst.msk [vmem:[#allocation2 + $0x10] sm:$0xff] %vm84_vm0, %v685_v0 }
 0x25b   :  { %v405_v1 = vpop.xlane.xlu2 %404 }
 0x25c   :  { %924 = vrcp.f32 %v405_v1  ;;  %v642_v3 = vand.u32 2147483648, %v405_v1  ;;  %v640_v6 = vand.u32 2147483647, %v405_v1  ;;  %vm636_vm14 = vweird.f32 %v405_v1 }
 0x25d   :  { %v688_v2 = vpop.f32.mrf.mxu1 }
 0x25e   :  { %730 = vst.msk [vmem:[#allocation2 + $0x18] sm:$0xff] %vm84_vm0, %v688_v2  ;;  %v643_v8 = vor.u32 1.1754944e-38, %v642_v3  ;;  %vm641_vm1 = vcmp.eq.f32.partialorder %v640_v6, 8.507059e+37 }
 0x262   :  { %v925_v52 = vpop.eup %924 }
 0x263   :  { %v632_v46 = vmul.f32 %v925_v52, %v405_v1  ;;  %v399_v59 = vpop.xlane.xlu1 %398  ;;  %vm637_vm13 = vweird.f32 %v925_v52 }
 0x264   :  { %926 = vrcp.f32 %v399_v59  ;;  %vm638_vm15 = vmor %vm636_vm14, %vm637_vm13  ;;  %v597_v13 = vand.u32 2147483648, %v399_v59  ;;  %v595_v18 = vand.u32 2147483647, %v399_v59  ;;  %vm591_vm3 = vweird.f32 %v399_v59 }
 0x265   :  { %v633_v30 = vsub.f32 1.0, %v632_v46  ;;  %v691_v15 = vpop.f32.mrf.mxu1 }
 0x266   :  { %731 = vst.msk [vmem:[#allocation2 + $0x20] sm:$0xff] %vm84_vm0, %v691_v15  ;;  %v598_v11 = vor.u32 1.1754944e-38, %v597_v13  ;;  %vm596_vm5 = vcmp.eq.f32.partialorder %v595_v18, 8.507059e+37 }
 0x267   :  { %v634_v5 = vmul.f32 %v925_v52, %v633_v30 }
 0x269   :  { %v635_v7 = vadd.f32 %v925_v52, %v634_v5 }
 0x26a   :  { %v927_v4 = vpop.eup %926 }
 0x26b   :  { %v587_v9 = vmul.f32 %v927_v4, %v399_v59  ;;  %v639_v12 = vsel %vm638_vm15, %v925_v52, %v635_v7  ;;  %vm592_vm2 = vweird.f32 %v927_v4 }
 0x26c   :  { %v644_v16 = vsel %vm641_vm1, %v643_v8, %v639_v12  ;;  %vm593_vm4 = vmor %vm591_vm3, %vm592_vm2 }
 0x26d   :  { %v588_v17 = vsub.f32 1.0, %v587_v9  ;;  %v645_v19 = vmul.f32 %v1375_v63, %v644_v16 }
 0x26e   :  { %v694_v35 = vpop.f32.mrf.mxu1 }
 0x26f   :  { %732 = vst.msk [vmem:[#allocation2 + $0x28] sm:$0xff] %vm84_vm0, %v694_v35  ;;  %v589_v10 = vmul.f32 %v927_v4, %v588_v17  ;;  %723 = vmatmul.f32.gmra.mxu3 %v645_v19 }
 0x270   :  { %661 = vst [vmem:[%s1572_s5 + $0x78] sm:$0xff] %v645_v19 }
 0x271   :  { %v590_v20 = vadd.f32 %v927_v4, %v589_v10 }
 0x273   :  { %v718_v22 = vpop.f32.mrf.mxu3  ;;  %v594_v26 = vsel %vm593_vm4, %v927_v4, %v590_v20 }
 0x274   :  { %740 = vst.msk [vmem:[#allocation2 + $0x68] sm:$0xff] %vm84_vm0, %v718_v22  ;;  %v599_v63 = vsel %vm596_vm5, %v598_v11, %v594_v26 }
 0x275   :  { %v600_v21 = vmul.f32 %v1406_v27, %v599_v63 }
 0x276   :  { %v697_v31 = vpop.f32.mrf.mxu1 }
 0x277   :  { %733 = vst.msk [vmem:[#allocation2 + $0x30] sm:$0xff] %vm84_vm0, %v697_v31  ;;  %714 = vmatmul.f32.gmra.mxu1 %v600_v21 }
 0x278   :  { %658 = vst [vmem:[%s1572_s5 + $0x60] sm:$0xff] %v600_v21  ;;  %s954_s5 = smov [#allocation2]  }
 0x279   :  { %s747_s15 = sshll.u32 %s954_s5, 4  ;;  %s748_s15 = int_to_ptr.vmem [resolvable:$true] %s747_s15 }
 0x27b   :  { %v679_v61 = vpop.f32.mrf.mxu0 }
 0x27c   :  { %727 = vst.msk [vmem:[#allocation2] sm:$0xff] %vm84_vm0, %v679_v61 }
 0x27e   :  { %v700_v62 = vpop.f32.mrf.mxu1 }
 0x27f   :  { %734 = vst.msk [vmem:[#allocation2 + $0x38] sm:$0xff] %vm84_vm0, %v700_v62 }
 0x285   :  { %v682_v32 = vpop.f32.mrf.mxu0 }
 0x286   :  { %728 = vst.msk [vmem:[#allocation2 + $0x8] sm:$0xff] %vm84_vm0, %v682_v32  ;;  %v703_v33 = vpop.f32.mrf.mxu1 }
 0x287   :  { %735 = vst.msk [vmem:[#allocation2 + $0x40] sm:$0xff] %vm84_vm0, %v703_v33 }
 0x28c   :  { %v721_v27 = vpop.f32.mrf.mxu3 }
 0x28d   :  { %741 = vst.msk [vmem:[#allocation2 + $0x70] sm:$0xff] %vm84_vm0, %v721_v27 }
 0x28e   :  { %v706_v34 = vpop.f32.mrf.mxu1 }
 0x28f   :  { %736 = vst.msk [vmem:[#allocation2 + $0x48] sm:$0xff] %vm84_vm0, %v706_v34 }
 0x296   :  { %v709_v38 = vpop.f32.mrf.mxu1 }
 0x297   :  { %737 = vst.msk [vmem:[#allocation2 + $0x50] sm:$0xff] %vm84_vm0, %v709_v38 }
 0x29e   :  { %v712_v36 = vpop.f32.mrf.mxu1 }
 0x29f   :  { %738 = vst.msk [vmem:[#allocation2 + $0x58] sm:$0xff] %vm84_vm0, %v712_v36 }
 0x2f2   :  { %v724_v37 = vpop.f32.mrf.mxu3 }
 0x2f3   :  { %742 = vst.msk [vmem:[#allocation2 + $0x78] sm:$0xff] %vm84_vm0, %v724_v37 }
 0x2f4   :  { %v715_v60 = vpop.f32.mrf.mxu1 }
 0x2f5   :  { %739 = vst.msk [vmem:[#allocation2 + $0x60] sm:$0xff] %vm84_vm0, %v715_v60 }
 0x2f6   :  { %755 = dma.vmem_to_hbm [thread:$0]  %s748_s15, 2048, %s750_s17, [#allocation3], %s955_s18, %s955_s18, %s956_s19  }
 0x2f7   :  { %952 = dma.done.wait [#allocation3], 2048  }
 0x2f8   :  { %953 = vsyncadd [#allocation3], 4294965248 }
 0x2f9   :  { %764 = vsyncpa [#allocation3], 1 }

</bundles_post_ra>
